<compile_context>
chip_gen: v7x
topology: tpu7x:2x2x1
jax: 0.10.0
libtpu: 0.0.40
codegen_flags: <defaults>
</compile_context>

<pallas_src>
import functools

import numpy as np
import jax
import jax.numpy as jnp
from jax.experimental import pallas as pl
from jax.experimental.pallas import tpu as pltpu


def _round_up(x, m):
    return ((x + m - 1) // m) * m


def _tap_major_perm(oh1, ow1, s, n_extra_levels):
    """Permutation of the (oh1, ow1) raster grid such that, for each of the
    n_extra_levels subsequent stride-s space-to-depth levels, the s*s taps of
    every window occupy s*s contiguous, equally sized row blocks.
    perm[r] = raster index (oh1*OW1 + ow1) placed at new row r."""
    oh, ow = np.meshgrid(np.arange(oh1), np.arange(ow1), indexing="ij")
    y = oh.reshape(-1).astype(np.int64)
    x = ow.reshape(-1).astype(np.int64)
    taps = []
    for _ in range(n_extra_levels):
        taps.append((y % s) * s + (x % s))
        y //= s
        x //= s
    rem_w = ow1 // (s ** n_extra_levels)
    key = y * rem_w + x                                  # final raster (oh, ow)
    base = (oh1 // (s ** n_extra_levels)) * rem_w
    for t in reversed(taps):                             # innermost level first
        key = key + t * base
        base *= s * s
    return np.argsort(key)


def _space_to_depth(x_nhwc, s):
    """kernel==stride: (B,H,W,C) -> (B, OH*OW, s*s*C); cols ordered (kh,kw,c)."""
    B, H, W, C = x_nhwc.shape
    OH, OW = H // s, W // s
    x = x_nhwc.reshape(B, OH, s, OW, s, C)
    x = jnp.transpose(x, (0, 1, 3, 2, 4, 5))
    return x.reshape(B, OH * OW, s * s * C)


def _const_idx(ndim):
    if ndim == 2:
        return lambda b: (0, 0)
    return lambda b: (0, 0, 0)


# ----------------------------------------------------------------------------
# Fused kernel: one grid step == one image, all four conv+ReLU layers.
# ----------------------------------------------------------------------------
def _encoder_fused_kernel(*refs, s2, m_sizes, n_layers):
    x_ref, o_ref = refs[0], refs[-1]
    wb = refs[1:-1]                      # (w1, b1, w2, b2, ...)

    # layer 1: single GEMM on pre-extracted patches (tap-major row order)
    act = jnp.dot(x_ref[0], wb[0][...], preferred_element_type=jnp.float32)
    act = jnp.maximum(act + wb[1][...], 0.0)
    if n_layers > 1:
        act = act.astype(jnp.bfloat16)

    # layers 2..n: per-tap GEMMs on contiguous row blocks, f32 accumulation
    for li in range(1, n_layers):
        w_ref, b_ref = wb[2 * li], wb[2 * li + 1]
        m_out = m_sizes[li]
        acc = jnp.dot(act[0:m_out, :], w_ref[0],
                      preferred_element_type=jnp.float32)
        for t in range(1, s2):
            acc = acc + jnp.dot(act[t * m_out:(t + 1) * m_out, :], w_ref[t],
                                preferred_element_type=jnp.float32)
        act = jnp.maximum(acc + b_ref[...], 0.0)
        if li < n_layers - 1:
            act = act.astype(jnp.bfloat16)   # inter-layer activations stay bf16

    o_ref[0] = act.astype(o_ref.dtype)


# ----------------------------------------------------------------------------
# Builder: pack weights once, return jitted forward (== horizontal_forward)
# ----------------------------------------------------------------------------
def make_encoder_forward(params, observation_shape, stride):
    C0, H, W = observation_shape
    s = int(stride)
    n_layers = len(params)
    s2 = s * s
    s_tot = s ** n_layers

    oh_f, ow_f = H // s_tot, W // s_tot
    assert oh_f >= 1 and ow_f >= 1, "input too small for the conv stack"
    h_use, w_use = oh_f * s_tot, ow_f * s_tot        # VALID-conv usable region
    oh1, ow1 = h_use // s, w_use // s
    m1 = oh1 * ow1
    m_sizes = tuple(m1 // (s2 ** i) for i in range(n_layers))
    m_out = m_sizes[-1]

    # ---- pack weights/bias once (hoisted out of the forward); pad channels
    #      only to a multiple of 8 (no 128-lane K blow-up between layers).
    packed, oc_real = [], []
    prev_ocp = None
    k1 = k1p = None
    for li, (w, b) in enumerate(params):
        OC, C, KH, KW = w.shape
        assert KH == s and KW == s, "fused path assumes kernel_size == stride"
        ocp = _round_up(OC, 8)
        if li == 0:
            k1 = s2 * C
            k1p = _round_up(k1, 8)
            wg = jnp.transpose(w, (2, 3, 1, 0)).reshape(k1, OC)      # (kh,kw,c) rows
            wg = jnp.pad(wg, ((0, k1p - k1), (0, ocp - OC)))
        else:
            wg = jnp.transpose(w, (2, 3, 1, 0)).reshape(s2, C, OC)   # tap-major
            wg = jnp.pad(wg, ((0, 0), (0, prev_ocp - C), (0, ocp - OC)))
        bg = jnp.pad(b, (0, ocp - OC)).astype(jnp.float32).reshape(1, ocp)
        packed.append((wg.astype(jnp.bfloat16), bg))
        oc_real.append(OC)
        prev_ocp = ocp
    oc_last, oc_last_p = oc_real[-1], prev_ocp

    perm = jnp.asarray(_tap_major_perm(oh1, ow1, s, n_layers - 1), jnp.int32)

    kernel = functools.partial(_encoder_fused_kernel, s2=s2,
                               m_sizes=m_sizes, n_layers=n_layers)

    in_specs = [pl.BlockSpec((1, m1, k1p), lambda b: (b, 0, 0))]
    for wg, bg in packed:
        in_specs.append(pl.BlockSpec(wg.shape, _const_idx(wg.ndim)))
        in_specs.append(pl.BlockSpec(bg.shape, _const_idx(bg.ndim)))
    out_spec = pl.BlockSpec((1, m_out, oc_last_p), lambda b: (b, 0, 0))

    wb_flat = [a for pair in packed for a in pair]
    weight_bytes = sum(int(a.size) * a.dtype.itemsize for a in wb_flat)

    # truthful per-image cost (real, unpadded dims)
    flops_img, c_prev = 0, C0
    for li, oc in enumerate(oc_real):
        flops_img += 2 * m_sizes[li] * (s2 * c_prev) * oc
        c_prev = oc

    def forward(x):
        batch_shape = x.shape[:-3]
        xb = x.reshape((-1,) + tuple(observation_shape))
        B = xb.shape[0]

        h = jnp.transpose(xb, (0, 2, 3, 1))[:, :h_use, :w_use, :]   # NHWC + crop
        patches = _space_to_depth(h.astype(jnp.bfloat16), s)        # (B, m1, k1)
        if k1p != k1:
            patches = jnp.pad(patches, ((0, 0), (0, 0), (0, k1p - k1)))
        patches = jnp.take(patches, perm, axis=1)                   # tap-major rows

        in_bytes = B * m1 * k1p * 2
        out_bytes = B * m_out * oc_last_p * 4
        cost = pl.CostEstimate(flops=B * flops_img, transcendentals=0,
                               bytes_accessed=in_bytes + weight_bytes + out_bytes)
        vmem_need = 2 * (m1 * k1p * 2) + 2 * weight_bytes + 2 * (m_out * oc_last_p * 4)
        vmem_limit = int(min(max(8 * vmem_need, 8 << 20), 32 << 20))

        out = pl.pallas_call(
            kernel,
            out_shape=jax.ShapeDtypeStruct((B, m_out, oc_last_p), jnp.float32),
            grid=(B,),
            in_specs=in_specs,
            out_specs=out_spec,
            compiler_params=pltpu.CompilerParams(
                dimension_semantics=("parallel",),    # batch across v7x TCs
                vmem_limit_bytes=vmem_limit),
            cost_estimate=cost,
        )(patches, *wb_flat)

        emb = out[:, :, :oc_last]                          # drop channel pad
        emb = jnp.transpose(emb, (0, 2, 1)).reshape(B, -1)  # (c, oh, ow) order
        return emb.reshape(batch_shape + (emb.shape[-1],))

    return jax.jit(forward)


# Precision-matched pure-JAX reference (bf16 operands, f32 accumulation).
def _reference_forward(params, x_nchw, stride):
    h = x_nchw
    for (w, b) in params:
        hb = h.astype(jnp.bfloat16).astype(jnp.float32)
        wb = w.astype(jnp.bfloat16).astype(jnp.float32)
        h = jax.lax.conv_general_dilated(
            hb, wb, (stride, stride), "VALID",
            dimension_numbers=("NCHW", "OIHW", "NCHW"),
            preferred_element_type=jnp.float32)
        h = jnp.maximum(h + b.reshape(1, -1, 1, 1), 0.0)
    return h.reshape(h.shape[0], -1)


if __name__ == "__main__":
    # Small synthetic config: depth=4, kernel_size=2, stride=2, ReLU,
    # observation_shape=(4, 16, 16) => spatial 16 -> 8 -> 4 -> 2 -> 1,
    # channels 4 -> 4 -> 8 -> 16 -> 32, embedded size = 32.
    B = 2
    obs_shape = (4, 16, 16)
    depth, ksize, stride = 4, 2, 2
    channels = [obs_shape[0], depth * 1, depth * 2, depth * 4, depth * 8]

    key = jax.random.PRNGKey(0)
    params = []
    for i in range(4):
        key, kw, kb = jax.random.split(key, 3)
        c_in, c_out = channels[i], channels[i + 1]
        fan_in = c_in * ksize * ksize
        w = jax.random.normal(kw, (c_out, c_in, ksize, ksize), jnp.float32)
        w = w * (1.0 / jnp.sqrt(fan_in))
        b = jax.random.normal(kb, (c_out,), jnp.float32) * 0.01
        params.append((w, b))

    key, kx = jax.random.split(key)
    x = jax.random.normal(kx, (B,) + obs_shape, jnp.float32)

    fwd = make_encoder_forward(params, obs_shape, stride)
    out = jax.block_until_ready(fwd(x))
    ref = _reference_forward(params, x, stride)

    assert out.shape == (B, depth * 8), out.shape
    assert jnp.allclose(out, ref, atol=1e-2, rtol=1e-2), "mismatch vs reference"
    print("KERNEL_OK")
</pallas_src>

<mosaic_0001>
module attributes {stable_mosaic.version = 11 : i64} {
  func.func @_encoder_fused_kernel(%arg0: i32, %arg1: memref<1x64x16xbf16, #tpu.memory_space<vmem>>, %arg2: memref<16x8xbf16, #tpu.memory_space<vmem>>, %arg3: memref<1x8xf32, #tpu.memory_space<vmem>>, %arg4: memref<4x8x8xbf16, #tpu.memory_space<vmem>>, %arg5: memref<1x8xf32, #tpu.memory_space<vmem>>, %arg6: memref<4x8x16xbf16, #tpu.memory_space<vmem>>, %arg7: memref<1x16xf32, #tpu.memory_space<vmem>>, %arg8: memref<4x16x32xbf16, #tpu.memory_space<vmem>>, %arg9: memref<1x32xf32, #tpu.memory_space<vmem>>, %arg10: memref<1x1x32xf32, #tpu.memory_space<vmem>>) attributes {dimension_semantics = [#tpu.dimension_semantics<parallel>], iteration_bounds = array<i64: 2>, scalar_prefetch = 0 : i64, scratch_operands = 0 : i64, tpu.core_type = #tpu.core_type<tc>, window_params = [{transform_indices = @transform_0, window_bounds = array<i64: 1, 64, 16>}, {pipeline_mode = #tpu.pipeline_mode<synchronous>, transform_indices = @transform_1, window_bounds = array<i64: 16, 8>}, {pipeline_mode = #tpu.pipeline_mode<synchronous>, transform_indices = @transform_2, window_bounds = array<i64: 1, 8>}, {pipeline_mode = #tpu.pipeline_mode<synchronous>, transform_indices = @transform_3, window_bounds = array<i64: 4, 8, 8>}, {pipeline_mode = #tpu.pipeline_mode<synchronous>, transform_indices = @transform_4, window_bounds = array<i64: 1, 8>}, {pipeline_mode = #tpu.pipeline_mode<synchronous>, transform_indices = @transform_5, window_bounds = array<i64: 4, 8, 16>}, {pipeline_mode = #tpu.pipeline_mode<synchronous>, transform_indices = @transform_6, window_bounds = array<i64: 1, 16>}, {pipeline_mode = #tpu.pipeline_mode<synchronous>, transform_indices = @transform_7, window_bounds = array<i64: 4, 16, 32>}, {pipeline_mode = #tpu.pipeline_mode<synchronous>, transform_indices = @transform_8, window_bounds = array<i64: 1, 32>}, {transform_indices = @transform_9, window_bounds = array<i64: 1, 1, 32>}]} {
    %c0 = arith.constant 0 : index
    %c0_0 = arith.constant 0 : index
    %c0_1 = arith.constant 0 : index
    %0 = vector.load %arg1[%c0, %c0_0, %c0_1] : memref<1x64x16xbf16, #tpu.memory_space<vmem>>, vector<1x64x16xbf16>
    %1 = vector.shape_cast %0 : vector<1x64x16xbf16> to vector<64x16xbf16>
    %c0_2 = arith.constant 0 : index
    %c0_3 = arith.constant 0 : index
    %2 = vector.load %arg2[%c0_2, %c0_3] : memref<16x8xbf16, #tpu.memory_space<vmem>>, vector<16x8xbf16>
    %cst = arith.constant dense<0.000000e+00> : vector<64x8xf32>
    %3 = tpu.matmul %1, %2, %cst {dimension_numbers = #tpu.dot_dimension_numbers<[1], [0], [0], [1], [0, 0, 1, 1], [], []>} : vector<64x16xbf16>, vector<16x8xbf16>, vector<64x8xf32> -> vector<64x8xf32>
    %c0_4 = arith.constant 0 : index
    %c0_5 = arith.constant 0 : index
    %4 = vector.load %arg3[%c0_4, %c0_5] : memref<1x8xf32, #tpu.memory_space<vmem>>, vector<1x8xf32>
    %5 = vector.broadcast %4 : vector<1x8xf32> to vector<64x8xf32>
    %6 = arith.addf %3, %5 : vector<64x8xf32>
    %cst_6 = arith.constant 0.000000e+00 : f32
    %7 = vector.broadcast %cst_6 : f32 to vector<64x8xf32>
    %8 = arith.maximumf %6, %7 : vector<64x8xf32>
    %9 = arith.truncf %8 : vector<64x8xf32> to vector<64x8xbf16>
    %10 = vector.extract_strided_slice %9 {offsets = [0, 0], sizes = [16, 8], strides = [1, 1]} : vector<64x8xbf16> to vector<16x8xbf16>
    %c0_7 = arith.constant 0 : index
    %c0_8 = arith.constant 0 : index
    %c0_9 = arith.constant 0 : index
    %11 = vector.load %arg4[%c0_7, %c0_8, %c0_9] : memref<4x8x8xbf16, #tpu.memory_space<vmem>>, vector<1x8x8xbf16>
    %12 = vector.shape_cast %11 : vector<1x8x8xbf16> to vector<8x8xbf16>
    %cst_10 = arith.constant dense<0.000000e+00> : vector<16x8xf32>
    %13 = tpu.matmul %10, %12, %cst_10 {dimension_numbers = #tpu.dot_dimension_numbers<[1], [0], [0], [1], [0, 0, 1, 1], [], []>} : vector<16x8xbf16>, vector<8x8xbf16>, vector<16x8xf32> -> vector<16x8xf32>
    %14 = vector.extract_strided_slice %9 {offsets = [16, 0], sizes = [16, 8], strides = [1, 1]} : vector<64x8xbf16> to vector<16x8xbf16>
    %c1 = arith.constant 1 : index
    %c0_11 = arith.constant 0 : index
    %c0_12 = arith.constant 0 : index
    %15 = vector.load %arg4[%c1, %c0_11, %c0_12] : memref<4x8x8xbf16, #tpu.memory_space<vmem>>, vector<1x8x8xbf16>
    %16 = vector.shape_cast %15 : vector<1x8x8xbf16> to vector<8x8xbf16>
    %cst_13 = arith.constant dense<0.000000e+00> : vector<16x8xf32>
    %17 = tpu.matmul %14, %16, %cst_13 {dimension_numbers = #tpu.dot_dimension_numbers<[1], [0], [0], [1], [0, 0, 1, 1], [], []>} : vector<16x8xbf16>, vector<8x8xbf16>, vector<16x8xf32> -> vector<16x8xf32>
    %18 = arith.addf %13, %17 : vector<16x8xf32>
    %19 = vector.extract_strided_slice %9 {offsets = [32, 0], sizes = [16, 8], strides = [1, 1]} : vector<64x8xbf16> to vector<16x8xbf16>
    %c2 = arith.constant 2 : index
    %c0_14 = arith.constant 0 : index
    %c0_15 = arith.constant 0 : index
    %20 = vector.load %arg4[%c2, %c0_14, %c0_15] : memref<4x8x8xbf16, #tpu.memory_space<vmem>>, vector<1x8x8xbf16>
    %21 = vector.shape_cast %20 : vector<1x8x8xbf16> to vector<8x8xbf16>
    %cst_16 = arith.constant dense<0.000000e+00> : vector<16x8xf32>
    %22 = tpu.matmul %19, %21, %cst_16 {dimension_numbers = #tpu.dot_dimension_numbers<[1], [0], [0], [1], [0, 0, 1, 1], [], []>} : vector<16x8xbf16>, vector<8x8xbf16>, vector<16x8xf32> -> vector<16x8xf32>
    %23 = arith.addf %18, %22 : vector<16x8xf32>
    %24 = vector.extract_strided_slice %9 {offsets = [48, 0], sizes = [16, 8], strides = [1, 1]} : vector<64x8xbf16> to vector<16x8xbf16>
    %c3 = arith.constant 3 : index
    %c0_17 = arith.constant 0 : index
    %c0_18 = arith.constant 0 : index
    %25 = vector.load %arg4[%c3, %c0_17, %c0_18] : memref<4x8x8xbf16, #tpu.memory_space<vmem>>, vector<1x8x8xbf16>
    %26 = vector.shape_cast %25 : vector<1x8x8xbf16> to vector<8x8xbf16>
    %cst_19 = arith.constant dense<0.000000e+00> : vector<16x8xf32>
    %27 = tpu.matmul %24, %26, %cst_19 {dimension_numbers = #tpu.dot_dimension_numbers<[1], [0], [0], [1], [0, 0, 1, 1], [], []>} : vector<16x8xbf16>, vector<8x8xbf16>, vector<16x8xf32> -> vector<16x8xf32>
    %28 = arith.addf %23, %27 : vector<16x8xf32>
    %c0_20 = arith.constant 0 : index
    %c0_21 = arith.constant 0 : index
    %29 = vector.load %arg5[%c0_20, %c0_21] : memref<1x8xf32, #tpu.memory_space<vmem>>, vector<1x8xf32>
    %30 = vector.broadcast %29 : vector<1x8xf32> to vector<16x8xf32>
    %31 = arith.addf %28, %30 : vector<16x8xf32>
    %cst_22 = arith.constant 0.000000e+00 : f32
    %32 = vector.broadcast %cst_22 : f32 to vector<16x8xf32>
    %33 = arith.maximumf %31, %32 : vector<16x8xf32>
    %34 = arith.truncf %33 : vector<16x8xf32> to vector<16x8xbf16>
    %35 = vector.extract_strided_slice %34 {offsets = [0, 0], sizes = [4, 8], strides = [1, 1]} : vector<16x8xbf16> to vector<4x8xbf16>
    %c0_23 = arith.constant 0 : index
    %c0_24 = arith.constant 0 : index
    %c0_25 = arith.constant 0 : index
    %36 = vector.load %arg6[%c0_23, %c0_24, %c0_25] : memref<4x8x16xbf16, #tpu.memory_space<vmem>>, vector<1x8x16xbf16>
    %37 = vector.shape_cast %36 : vector<1x8x16xbf16> to vector<8x16xbf16>
    %cst_26 = arith.constant dense<0.000000e+00> : vector<4x16xf32>
    %38 = tpu.matmul %35, %37, %cst_26 {dimension_numbers = #tpu.dot_dimension_numbers<[1], [0], [0], [1], [0, 0, 1, 1], [], []>} : vector<4x8xbf16>, vector<8x16xbf16>, vector<4x16xf32> -> vector<4x16xf32>
    %39 = vector.extract_strided_slice %34 {offsets = [4, 0], sizes = [4, 8], strides = [1, 1]} : vector<16x8xbf16> to vector<4x8xbf16>
    %c1_27 = arith.constant 1 : index
    %c0_28 = arith.constant 0 : index
    %c0_29 = arith.constant 0 : index
    %40 = vector.load %arg6[%c1_27, %c0_28, %c0_29] : memref<4x8x16xbf16, #tpu.memory_space<vmem>>, vector<1x8x16xbf16>
    %41 = vector.shape_cast %40 : vector<1x8x16xbf16> to vector<8x16xbf16>
    %cst_30 = arith.constant dense<0.000000e+00> : vector<4x16xf32>
    %42 = tpu.matmul %39, %41, %cst_30 {dimension_numbers = #tpu.dot_dimension_numbers<[1], [0], [0], [1], [0, 0, 1, 1], [], []>} : vector<4x8xbf16>, vector<8x16xbf16>, vector<4x16xf32> -> vector<4x16xf32>
    %43 = arith.addf %38, %42 : vector<4x16xf32>
    %44 = vector.extract_strided_slice %34 {offsets = [8, 0], sizes = [4, 8], strides = [1, 1]} : vector<16x8xbf16> to vector<4x8xbf16>
    %c2_31 = arith.constant 2 : index
    %c0_32 = arith.constant 0 : index
    %c0_33 = arith.constant 0 : index
    %45 = vector.load %arg6[%c2_31, %c0_32, %c0_33] : memref<4x8x16xbf16, #tpu.memory_space<vmem>>, vector<1x8x16xbf16>
    %46 = vector.shape_cast %45 : vector<1x8x16xbf16> to vector<8x16xbf16>
    %cst_34 = arith.constant dense<0.000000e+00> : vector<4x16xf32>
    %47 = tpu.matmul %44, %46, %cst_34 {dimension_numbers = #tpu.dot_dimension_numbers<[1], [0], [0], [1], [0, 0, 1, 1], [], []>} : vector<4x8xbf16>, vector<8x16xbf16>, vector<4x16xf32> -> vector<4x16xf32>
    %48 = arith.addf %43, %47 : vector<4x16xf32>
    %49 = vector.extract_strided_slice %34 {offsets = [12, 0], sizes = [4, 8], strides = [1, 1]} : vector<16x8xbf16> to vector<4x8xbf16>
    %c3_35 = arith.constant 3 : index
    %c0_36 = arith.constant 0 : index
    %c0_37 = arith.constant 0 : index
    %50 = vector.load %arg6[%c3_35, %c0_36, %c0_37] : memref<4x8x16xbf16, #tpu.memory_space<vmem>>, vector<1x8x16xbf16>
    %51 = vector.shape_cast %50 : vector<1x8x16xbf16> to vector<8x16xbf16>
    %cst_38 = arith.constant dense<0.000000e+00> : vector<4x16xf32>
    %52 = tpu.matmul %49, %51, %cst_38 {dimension_numbers = #tpu.dot_dimension_numbers<[1], [0], [0], [1], [0, 0, 1, 1], [], []>} : vector<4x8xbf16>, vector<8x16xbf16>, vector<4x16xf32> -> vector<4x16xf32>
    %53 = arith.addf %48, %52 : vector<4x16xf32>
    %c0_39 = arith.constant 0 : index
    %c0_40 = arith.constant 0 : index
    %54 = vector.load %arg7[%c0_39, %c0_40] : memref<1x16xf32, #tpu.memory_space<vmem>>, vector<1x16xf32>
    %55 = vector.broadcast %54 : vector<1x16xf32> to vector<4x16xf32>
    %56 = arith.addf %53, %55 : vector<4x16xf32>
    %cst_41 = arith.constant 0.000000e+00 : f32
    %57 = vector.broadcast %cst_41 : f32 to vector<4x16xf32>
    %58 = arith.maximumf %56, %57 : vector<4x16xf32>
    %59 = arith.truncf %58 : vector<4x16xf32> to vector<4x16xbf16>
    %60 = vector.extract_strided_slice %59 {offsets = [0, 0], sizes = [1, 16], strides = [1, 1]} : vector<4x16xbf16> to vector<1x16xbf16>
    %c0_42 = arith.constant 0 : index
    %c0_43 = arith.constant 0 : index
    %c0_44 = arith.constant 0 : index
    %61 = vector.load %arg8[%c0_42, %c0_43, %c0_44] : memref<4x16x32xbf16, #tpu.memory_space<vmem>>, vector<1x16x32xbf16>
    %62 = vector.shape_cast %61 : vector<1x16x32xbf16> to vector<16x32xbf16>
    %cst_45 = arith.constant dense<0.000000e+00> : vector<1x32xf32>
    %63 = tpu.matmul %60, %62, %cst_45 {dimension_numbers = #tpu.dot_dimension_numbers<[1], [0], [0], [1], [0, 0, 1, 1], [], []>} : vector<1x16xbf16>, vector<16x32xbf16>, vector<1x32xf32> -> vector<1x32xf32>
    %64 = vector.extract_strided_slice %59 {offsets = [1, 0], sizes = [1, 16], strides = [1, 1]} : vector<4x16xbf16> to vector<1x16xbf16>
    %c1_46 = arith.constant 1 : index
    %c0_47 = arith.constant 0 : index
    %c0_48 = arith.constant 0 : index
    %65 = vector.load %arg8[%c1_46, %c0_47, %c0_48] : memref<4x16x32xbf16, #tpu.memory_space<vmem>>, vector<1x16x32xbf16>
    %66 = vector.shape_cast %65 : vector<1x16x32xbf16> to vector<16x32xbf16>
    %cst_49 = arith.constant dense<0.000000e+00> : vector<1x32xf32>
    %67 = tpu.matmul %64, %66, %cst_49 {dimension_numbers = #tpu.dot_dimension_numbers<[1], [0], [0], [1], [0, 0, 1, 1], [], []>} : vector<1x16xbf16>, vector<16x32xbf16>, vector<1x32xf32> -> vector<1x32xf32>
    %68 = arith.addf %63, %67 : vector<1x32xf32>
    %69 = vector.extract_strided_slice %59 {offsets = [2, 0], sizes = [1, 16], strides = [1, 1]} : vector<4x16xbf16> to vector<1x16xbf16>
    %c2_50 = arith.constant 2 : index
    %c0_51 = arith.constant 0 : index
    %c0_52 = arith.constant 0 : index
    %70 = vector.load %arg8[%c2_50, %c0_51, %c0_52] : memref<4x16x32xbf16, #tpu.memory_space<vmem>>, vector<1x16x32xbf16>
    %71 = vector.shape_cast %70 : vector<1x16x32xbf16> to vector<16x32xbf16>
    %cst_53 = arith.constant dense<0.000000e+00> : vector<1x32xf32>
    %72 = tpu.matmul %69, %71, %cst_53 {dimension_numbers = #tpu.dot_dimension_numbers<[1], [0], [0], [1], [0, 0, 1, 1], [], []>} : vector<1x16xbf16>, vector<16x32xbf16>, vector<1x32xf32> -> vector<1x32xf32>
    %73 = arith.addf %68, %72 : vector<1x32xf32>
    %74 = vector.extract_strided_slice %59 {offsets = [3, 0], sizes = [1, 16], strides = [1, 1]} : vector<4x16xbf16> to vector<1x16xbf16>
    %c3_54 = arith.constant 3 : index
    %c0_55 = arith.constant 0 : index
    %c0_56 = arith.constant 0 : index
    %75 = vector.load %arg8[%c3_54, %c0_55, %c0_56] : memref<4x16x32xbf16, #tpu.memory_space<vmem>>, vector<1x16x32xbf16>
    %76 = vector.shape_cast %75 : vector<1x16x32xbf16> to vector<16x32xbf16>
    %cst_57 = arith.constant dense<0.000000e+00> : vector<1x32xf32>
    %77 = tpu.matmul %74, %76, %cst_57 {dimension_numbers = #tpu.dot_dimension_numbers<[1], [0], [0], [1], [0, 0, 1, 1], [], []>} : vector<1x16xbf16>, vector<16x32xbf16>, vector<1x32xf32> -> vector<1x32xf32>
    %78 = arith.addf %73, %77 : vector<1x32xf32>
    %c0_58 = arith.constant 0 : index
    %c0_59 = arith.constant 0 : index
    %79 = vector.load %arg9[%c0_58, %c0_59] : memref<1x32xf32, #tpu.memory_space<vmem>>, vector<1x32xf32>
    %80 = arith.addf %78, %79 : vector<1x32xf32>
    %cst_60 = arith.constant 0.000000e+00 : f32
    %81 = vector.broadcast %cst_60 : f32 to vector<1x32xf32>
    %82 = arith.maximumf %80, %81 : vector<1x32xf32>
    %c0_61 = arith.constant 0 : index
    %c0_62 = arith.constant 0 : index
    %c0_63 = arith.constant 0 : index
    %83 = vector.load %arg10[%c0_61, %c0_62, %c0_63] : memref<1x1x32xf32, #tpu.memory_space<vmem>>, vector<1x1x32xf32>
    %84 = vector.shape_cast %83 : vector<1x1x32xf32> to vector<1x32xf32>
    %85 = vector.shape_cast %82 : vector<1x32xf32> to vector<1x1x32xf32>
    tpu.vector_store %arg10[%c0_61, %c0_62, %c0_63], %85 {strides = array<i32>} : memref<1x1x32xf32, #tpu.memory_space<vmem>>, vector<1x1x32xf32>,
    return
  }
  func.func @transform_0(%arg0: i32) -> (i32, i32, i32) {
    %c0_i32 = arith.constant 0 : i32
    %c0_i32_0 = arith.constant 0 : i32
    %c0_i32_1 = arith.constant 0 : i32
    return %arg0, %c0_i32, %c0_i32_0 : i32, i32, i32
  }
  func.func @transform_1(%arg0: i32) -> (i32, i32) {
    %c0_i32 = arith.constant 0 : i32
    %c0_i32_0 = arith.constant 0 : i32
    %c0_i32_1 = arith.constant 0 : i32
    return %c0_i32, %c0_i32_0 : i32, i32
  }
  func.func @transform_2(%arg0: i32) -> (i32, i32) {
    %c0_i32 = arith.constant 0 : i32
    %c0_i32_0 = arith.constant 0 : i32
    %c0_i32_1 = arith.constant 0 : i32
    return %c0_i32, %c0_i32_0 : i32, i32
  }
  func.func @transform_3(%arg0: i32) -> (i32, i32, i32) {
    %c0_i32 = arith.constant 0 : i32
    %c0_i32_0 = arith.constant 0 : i32
    %c0_i32_1 = arith.constant 0 : i32
    %c0_i32_2 = arith.constant 0 : i32
    return %c0_i32, %c0_i32_0, %c0_i32_1 : i32, i32, i32
  }
  func.func @transform_4(%arg0: i32) -> (i32, i32) {
    %c0_i32 = arith.constant 0 : i32
    %c0_i32_0 = arith.constant 0 : i32
    %c0_i32_1 = arith.constant 0 : i32
    return %c0_i32, %c0_i32_0 : i32, i32
  }
  func.func @transform_5(%arg0: i32) -> (i32, i32, i32) {
    %c0_i32 = arith.constant 0 : i32
    %c0_i32_0 = arith.constant 0 : i32
    %c0_i32_1 = arith.constant 0 : i32
    %c0_i32_2 = arith.constant 0 : i32
    return %c0_i32, %c0_i32_0, %c0_i32_1 : i32, i32, i32
  }
  func.func @transform_6(%arg0: i32) -> (i32, i32) {
    %c0_i32 = arith.constant 0 : i32
    %c0_i32_0 = arith.constant 0 : i32
    %c0_i32_1 = arith.constant 0 : i32
    return %c0_i32, %c0_i32_0 : i32, i32
  }
  func.func @transform_7(%arg0: i32) -> (i32, i32, i32) {
    %c0_i32 = arith.constant 0 : i32
    %c0_i32_0 = arith.constant 0 : i32
    %c0_i32_1 = arith.constant 0 : i32
    %c0_i32_2 = arith.constant 0 : i32
    return %c0_i32, %c0_i32_0, %c0_i32_1 : i32, i32, i32
  }
  func.func @transform_8(%arg0: i32) -> (i32, i32) {
    %c0_i32 = arith.constant 0 : i32
    %c0_i32_0 = arith.constant 0 : i32
    %c0_i32_1 = arith.constant 0 : i32
    return %c0_i32, %c0_i32_0 : i32, i32
  }
  func.func @transform_9(%arg0: i32) -> (i32, i32, i32) {
    %c0_i32 = arith.constant 0 : i32
    %c0_i32_0 = arith.constant 0 : i32
    %c0_i32_1 = arith.constant 0 : i32
    return %arg0, %c0_i32, %c0_i32_0 : i32, i32, i32
  }
}

</mosaic_0001>

<bundles_post_ra>
// kernel: forward.1
= control target key start
LH: loop header
LB: loop body
LE: loop exit
PB: predicated region body
PF: predicated region fallthrough
CT: control target
= control target key end

     0   :  { %14 = vsyncpa [#allocation3], 0  ;;  %s1710_s0 = inlined_call_operand.vmem [shape: bf16[2,64,16], index: 0, kind: input, shape index: {}]   ;;  %s1711_s1 = inlined_call_operand.vmem [shape: bf16[16,8], index: 1, kind: input, shape index: {}]   ;;  %s1712_s2 = inlined_call_operand.vmem [shape: f32[1,8], index: 2, kind: input, shape index: {}]   ;;  %s1713_s3 = inlined_call_operand.vmem [shape: bf16[4,8,8], index: 3, kind: input, shape index: {}]   ;;  %s1714_s4 = inlined_call_operand.vmem [shape: f32[1,8], index: 4, kind: input, shape index: {}]   ;;  %s1715_s5 = inlined_call_operand.vmem [shape: bf16[4,8,16], index: 5, kind: input, shape index: {}]   ;;  %s1716_s6 = inlined_call_operand.vmem [shape: f32[1,16], index: 6, kind: input, shape index: {}]   ;;  %s1717_s7 = inlined_call_operand.vmem [shape: bf16[4,16,32], index: 7, kind: input, shape index: {}]   ;;  %s1718_s8 = inlined_call_operand.vmem [shape: f32[1,32], index: 8, kind: input, shape index: {}]   ;;  %s1719_s9 = inlined_call_operand.hbm [shape: f32[2,1,32], index: 9, kind: output, shape index: {}]  }
   0x1   :  { %16 = vsyncpa [#allocation3 + $0x1], 0  ;;  %s1499_s30 = smov 0   ;;  %s1501_s10 = smov 0  }
   0x2   :  { %s1503_s11 = smov 0   ;;  %s1505_s12 = smov 0  }
   0x3 LB: > { %s1520_s13 = sadd.s32 4294967295, %s1444_s12   ;;  %s1171_s14 = sadd.s32 4294967294, %s1444_s12   ;;  %s1444_s12 = sphi %s1505_s12, %s1725_s12   ;;  %s1440_s11 = sphi %s1503_s11, %s1724_s11   ;;  %s1436_s10 = sphi %s1501_s10, %s1723_s10   ;;  %s1432_s30 = sphi %s1499_s30, %s1722_s30  }
   0x4   : > { %s1524_s15 = sadd.s32 1, %s1444_s12   ;;  %s223_s16 = sadd.s32 1, %s1440_s11 }
   0x5   : > { %s220_s17 = ssub.s32 %s1444_s12, %s1524_s15  ;;  %p233_p0 = scmp.ne.s32.totalorder %s1440_s11, %s1436_s10 }
   0x6   : > { %p221_p1 = scmp.eq.s32.totalorder %s220_s17, 0  ;;  %p234_p2 = scmp.eq.s32.totalorder %s1520_s13, 1 }
   0x7   : > { %p239_p3 = scmp.ne.s32.totalorder %s1436_s10, %s1432_s30  ;;  %p240_p4 = scmp.eq.s32.totalorder %s1171_s14, 1 }
   0x8   : > { %s1535_s18 = scalar_select %p221_p1, %s1440_s11, %s223_s16  }
   0x9   : > { %p1537_p5 = por %p234_p2, %p233_p0  ;;  %p1541_p6 = por %p240_p4, %p239_p3 }
   0xa   : > { %p1174_p7 = scmp.ge.s32.totalorder %s1444_s12, 1  ;;  %p290_p8 = scmp.lt.s32.totalorder %s1444_s12, 3 }
   0xc   : > { %p291_p9 = pnand %p1174_p7, %p290_p8 }
   0xd   : > { %v1373_v0 = vld [vmem:[%s1711_s1] sm:$0xff] (!%p291_p9)   ;;  %p325_p10 = scmp.lt.s32.totalorder (!%p291_p9), %s1520_s13, 1  ;;  %vm374_vm0 = vcmask (!%p291_p9), 130048   ;;  %vm471_vm1 = vcmask (!%p291_p9), 1043456   ;;  %v1446_v6 = vmov (!%p291_p9), 0.0   ;;  %vm1447_vm2 = vmmov (!%p291_p9), 0  }
   0xe   : > { %294 = sbr.rel (%p291_p9) target bundleno = 961 (0x3c1), region = 56  ;;  %1250 = vmatprep.subr.bf16.mxu0 (!%p291_p9), %v1373_v0  ;;  %v1187_v5 = vld [vmem:[%s1713_s3 + $0x4] sm:$0xf] (!%p291_p9)  ;;  %1260 = vmatprep.subr.bf16.mxu1 (!%p291_p9), %v1446_v6  ;;  %v1190_v8 = vld [vmem:[%s1713_s3 + $0x8] sm:$0xf] (!%p291_p9)  ;;  %vm467_vm3 = vcmask (!%p291_p9), 64512  }
   0xf   : > { %1251 = vmatpush3.bf16.msra.mxu0 (!%p291_p9), %v1373_v0  ;;  %v473_v7 = vsel (!%p291_p9), %vm471_vm1, %v1187_v5, 0  ;;  %1262 = vmatprep.mubr.msk.bf16.mxu1 (!%p291_p9), %vm1447_vm2, %v1446_v6  ;;  %v569_v9 = vsel (!%p291_p9), %vm471_vm1, %v1190_v8, 0  ;;  %v1177_v10 = vld [vmem:[%s1712_s2] ss:$0 sm:$0xff] (!%p291_p9)  ;;  %v1192_v37 = vld [vmem:[%s1713_s3 + $0xc] sm:$0xf] (!%p291_p9) }
  0x10   : > { %1272 = vmatprep.subr.bf16.mxu0 (!%p291_p9), %v1446_v6  ;;  %1261 = vmatpush3.bf16.msra.mxu1 (!%p291_p9), %v473_v7  ;;  %v464_v19 = vld [vmem:[%s1713_s3] sm:$0xf] (!%p291_p9)  ;;  %v620_v41 = vsel (!%p291_p9), %vm471_vm1, %v1192_v37, 0  ;;  %v1195_v45 = vld [vmem:[%s1715_s5 + $0x4] sm:$0xf] (!%p291_p9)  ;;  %s323_s22 = sand.u32 (!%p291_p9), 1, %s1436_s10  }
  0x11   : > { %1266 = vmatprep.subr.bf16.mxu1 (!%p291_p9), %v1446_v6  ;;  %v520_v25 = vsel (!%p291_p9), %vm471_vm1, %v464_v19, 0  ;;  %v677_v43 = vld [vmem:[%s1715_s5] sm:$0xf] (!%p291_p9)  ;;  %v686_v46 = vsel (!%p291_p9), %vm471_vm1, %v1195_v45, 0  ;;  %v1380_v45 = vld [vmem:[%s1717_s7 + $0x10] sm:$0xff] (!%p291_p9)   ;;  %s1217_s25 = sshll.u32 (!%p291_p9), %s1520_s13, 4 }
  0x12   : > { %v732_v44 = vsel (!%p291_p9), %vm471_vm1, %v677_v43, 0  ;;  %v1194_v0 = vld [vmem:[%s1714_s4] ss:$0 sm:$0xff] (!%p291_p9)  ;;  %v1381_v43 = vld [vmem:[%s1717_s7 + $0x18] sm:$0xff] (!%p291_p9)   ;;  %s324_s26 = scalar_lea.vmem (!%p291_p9), [#allocation2], %s323_s22  ;;  %vm1101_vm4 = vcmask (!%p291_p9), 253952   ;;  %s1668_s14 = scalar_lea.hbm (!%p291_p9), %s1719_s9, %s1217_s25 }
  0x13   : > { %v1379_v19 = vld [vmem:[%s1717_s7] sm:$0xff] (!%p291_p9)   ;;  %s1104_s16 = scalar_lea.sflag (!%p291_p9), [#allocation3], %s323_s22 }
  0x14   : > { %v1202_v37 = vld [vmem:[%s1716_s6] ss:$0 sm:$0xff] (!%p291_p9) }
  0x15   : > { %s326_s23 = scalar_select %p325_p10, %s1520_s13, 1 }
  0x16   : > { %s1448_s13 = smov [#allocation2]  }
  0x17   : > { %s1220_s24 = sshll.u32 %s326_s23, 5  ;;  %s1386_s21 = sshll.u32 %s1448_s13, 4  ;;  %s1387_s21 = int_to_ptr.vmem [resolvable:$false] %s1386_s21 }
  0x18   : > { %s329_s27 = scalar_lea.vmem %s1710_s0, %s1220_s24  ;;  %s1388_s23 = scalar_lea.vmem %s1387_s21, 32 }
  0x19   : > { %v1374_v1 = vld [vmem:[%s329_s27] sm:$0xff]   ;;  %v1375_v2 = vld [vmem:[%s329_s27 + $0x8] sm:$0xff]   ;;  %v1376_v3 = vld [vmem:[%s329_s27 + $0x10] sm:$0xff]  }
  0x1a   : > { %1252 = vmatprep.mubr.msk.bf16.mxu0 %vm374_vm0, %v1374_v1  ;;  %v1377_v4 = vld [vmem:[%s329_s27 + $0x18] sm:$0xff]   ;;  %s1116_s27 = sshll.u32 %s324_s26, 4  ;;  %s1670_s27 = int_to_ptr.vmem [resolvable:$true] %s1116_s27 }
  0x1b   : > { %1253 = vmatmul.mubr.msk.bf16.vlgmr.msra.gmra.mrb[0].mxu0 %vm374_vm0, %v1375_v2  ;;  %s1382_s17 = scalar_lea.vmem %s1670_s27, 16  ;;  %p1389_p0 = scmp.lt.s32.totalorder %s1670_s27, %s1387_s21 }
  0x1c   : > { %1256 = vmatprep.mubr.msk.bf16.mxu0 %vm374_vm0, %v1376_v3  ;;  %1273 = vmatpush3.bf16.msra.mxu0 %v569_v9  ;;  %v1200_v9 = vld [vmem:[%s1715_s5 + $0xc] sm:$0xf]  ;;  %p1383_p11 = scmp.ne.s32.totalorder %s1670_s27, %s1382_s17  ;;  %p1390_p1 = scmp.lt.s32.totalorder %s1388_s23, %s1382_s17 }
  0x1d   : > { %1284 = vmatprep.subr.bf16.mxu0 %v1446_v6 }
  0x1e   : > { %p1384_p12 = pnand %p1383_p11, %p1537_p5  ;;  %p1391_p2 = por %p1390_p1, %p1389_p0 }
  0x20   : > { %p1385_p13 = pneg %p1384_p12 }
  0x22   : > { %p1392_p3 = pnand %p1391_p2, %p1385_p13 }
  0x23   : > { %1257 = vmatmul.mubr.msk.bf16.gmra.mrb[4].mxu0 %vm374_vm0, %v1377_v4 }
  0x24   : > { %1274 = vmatprep.mubr.msk.bf16.mxu0 %vm1447_vm2, %v1446_v6 }
  0xee   : > { %v1254_v11 = vpop.f32.mrb[0].mxu0 }
  0xef   : > { %v430_v12 = vadd.f32 %v1254_v11, %v1177_v10  ;;  %v421_v13 = vpop.f32.mrb[1].mxu0 }
  0xf0   : > { %v422_v14 = vadd.f32 %v1177_v10, %v421_v13  ;;  %v1255_v15 = vpop.f32.mrb[2].mxu0 }
  0xf1   : > { %v433_v16 = vadd.f32 %v1255_v15, %v1177_v10  ;;  %v424_v17 = vpop.f32.mrb[3].mxu0  ;;  %v454_v20 = vmax.f32 %v430_v12, 0.0  ;;  %v1198_v12 = vld [vmem:[%s1715_s5 + $0x8] sm:$0xf] }
  0xf2   : > { %v425_v18 = vadd.f32 %v1177_v10, %v424_v17  ;;  %v452_v22 = vmax.f32 %v422_v14, 0.0  ;;  %v831_v14 = vsel %vm471_vm1, %v1200_v9, 0 }
  0xf3   : > { %v455_v21 = vmax.f32 %v433_v16, 0.0  ;;  %v781_v16 = vsel %vm471_vm1, %v1198_v12, 0 }
  0xf4   : > { %v453_v23 = vmax.f32 %v425_v18, 0.0 }
  0xf5   : > { %v461_v24 = vpack.c.bf16 %v455_v21, %v454_v20  ;;  %v1378_v20 = vld [vmem:[%s1717_s7 + $0x8] sm:$0xff]  }
  0xf6   : > { %v460_v26 = vpack.c.bf16 %v453_v23, %v452_v22  ;;  %v1258_v27 = vpop.f32.mrb[4].mxu0 }
  0xf7   : > { %v446_v28 = vadd.f32 %v1258_v27, %v1177_v10  ;;  %v437_v29 = vpop.f32.mrb[5].mxu0  ;;  %1263 = vmatmul.mubr.msk.bf16.vlgmr.msra.gmra.mrb[0].mxu1 %vm467_vm3, %v461_v24 }
  0xf8   : > { %v438_v30 = vadd.f32 %v1177_v10, %v437_v29  ;;  %1267 = vmatpush3.bf16.msra.mxu1 %v520_v25  ;;  %v1259_v31 = vpop.f32.mrb[6].mxu0  ;;  %1268 = vmatprep.mubr.msk.bf16.mxu1 %vm1447_vm2, %v1446_v6 }
  0xf9   : > { %v458_v32 = vmax.f32 %v446_v28, 0.0  ;;  %v449_v33 = vadd.f32 %v1259_v31, %v1177_v10  ;;  %v440_v34 = vpop.f32.mrb[7].mxu0  ;;  %1278 = vmatprep.subr.bf16.mxu1 %v1446_v6 }
  0xfa   : > { %v456_v35 = vmax.f32 %v438_v30, 0.0  ;;  %v441_v36 = vadd.f32 %v1177_v10, %v440_v34 }
  0xfb   : > { %v459_v38 = vmax.f32 %v449_v33, 0.0 }
  0xfc   : > { %v457_v39 = vmax.f32 %v441_v36, 0.0 }
  0xfd   : > { %v463_v40 = vpack.c.bf16 %v459_v38, %v458_v32 }
  0xfe   : > { %v462_v42 = vpack.c.bf16 %v457_v39, %v456_v35 }
  0xff   : > { %1269 = vmatmul.mubr.msk.bf16.vlgmr.msra.gmra.mrb[4].mxu1 %vm467_vm3, %v460_v26 }
 0x100   : > { %1279 = vmatpush3.bf16.msra.mxu1 %v620_v41  ;;  %1275 = vmatmul.mubr.msk.bf16.vlgmr.msra.gmra.mrb[8].mxu0 %vm467_vm3, %v462_v42 }
 0x101   : > { %1280 = vmatprep.mubr.msk.bf16.mxu1 %vm1447_vm2, %v1446_v6  ;;  %1290 = vmatprep.subr.bf16.mxu1 %v1446_v6 }
 0x102   : > { %1286 = vmatprep.mubr.msk.bf16.mxu0 %vm1447_vm2, %v1446_v6  ;;  %1285 = vmatpush3.bf16.msra.mxu0 %v686_v46 }
 0x103   : > { %1296 = vmatprep.subr.bf16.mxu0 %v1446_v6 }
 0x107   : > { %1281 = vmatmul.mubr.msk.bf16.vlgmr.msra.gmra.mrb[8].mxu1 %vm467_vm3, %v463_v40 }
 0x108   : > { %1292 = vmatprep.mubr.msk.bf16.mxu1 %vm1447_vm2, %v1446_v6  ;;  %1291 = vmatpush3.bf16.msra.mxu1 %v732_v44 }
 0x109   : > { %1302 = vmatprep.subr.bf16.mxu1 %v1446_v6 }
 0x1ca   : > { %v509_v47 = vpop.f32.mrb[0].mxu1 }
 0x1cb   : > { %v1264_v48 = vpop.f32.mrb[1].mxu1 }
 0x1cc   : > { %v512_v49 = vpop.f32.mrb[2].mxu1 }
 0x1cd   : > { %v1265_v50 = vpop.f32.mrb[3].mxu1 }
 0x1d2   : > { %v556_v51 = vpop.f32.mrb[4].mxu1 }
 0x1d3   : > { %v557_v52 = vadd.f32 %v556_v51, %v509_v47  ;;  %v1270_v53 = vpop.f32.mrb[5].mxu1  ;;  %v605_v54 = vpop.f32.mrb[8].mxu0 }
 0x1d4   : > { %v559_v55 = vpop.f32.mrb[6].mxu1  ;;  %v1276_v56 = vpop.f32.mrb[9].mxu0 }
 0x1d5   : > { %v612_v57 = vadd.f32 %v605_v54, %v557_v52  ;;  %v560_v58 = vadd.f32 %v559_v55, %v512_v49  ;;  %v1271_v59 = vpop.f32.mrb[7].mxu1  ;;  %v608_v60 = vpop.f32.mrb[10].mxu0 }
 0x1d6   : > { %v1277_v61 = vpop.f32.mrb[11].mxu0 }
 0x1d7   : > { %v613_v62 = vadd.f32 %v608_v60, %v560_v58 }
 0x1da   : > { %v656_v63 = vpop.f32.mrb[8].mxu1 }
 0x1db   : > { %v663_v1 = vadd.f32 %v656_v63, %v612_v57  ;;  %v1282_v2 = vpop.f32.mrb[9].mxu1 }
 0x1dc   : > { %v659_v3 = vpop.f32.mrb[10].mxu1 }
 0x1dd   : > { %v672_v4 = vadd.f32 %v1194_v0, %v663_v1  ;;  %v664_v5 = vadd.f32 %v659_v3, %v613_v62  ;;  %v1283_v7 = vpop.f32.mrb[11].mxu1 }
 0x1df   : > { %v673_v8 = vadd.f32 %v1194_v0, %v664_v5  ;;  %v674_v10 = vmax.f32 %v672_v4, 0.0  ;;  %v1098_v0 = vld [vmem:[%s1718_s8] sm:$0x1] }
 0x1e1   : > { %v675_v11 = vmax.f32 %v673_v8, 0.0 }
 0x1e3   : > { %v676_v13 = vpack.c.bf16 %v675_v11, %v674_v10 }
 0x1e5   : > { %1293 = vmatmul.mubr.msk.bf16.vlgmr.msra.gmra.mrb[12].mxu1 %vm467_vm3, %v676_v13  ;;  %v681_v15 = vrot.slane %v676_v13, 2  ;;  %v826_v17 = vrot.slane %v676_v13, 6  ;;  %v776_v18 = vrot.slane %v676_v13, 4 }
 0x1e6   : > { %1303 = vmatpush3.bf16.msra.mxu1 %v831_v14  ;;  %1304 = vmatprep.mubr.msk.bf16.mxu1 %vm1447_vm2, %v1446_v6 }
 0x1e7   : > { %1287 = vmatmul.mubr.msk.bf16.vlgmr.msra.gmra.mrb[12].mxu0 %vm467_vm3, %v681_v15  ;;  %1314 = vmatprep.subr.bf16.mxu1 %v1446_v6 }
 0x1e8   : > { %1297 = vmatpush3.bf16.msra.mxu0 %v781_v16  ;;  %1298 = vmatprep.mubr.msk.bf16.mxu0 %vm1447_vm2, %v1446_v6 }
 0x1e9   : > { %1308 = vmatprep.subr.bf16.mxu0 %v1446_v6 }
 0x1ed   : > { %1305 = vmatmul.mubr.msk.bf16.vlgmr.msra.gmra.mrb[16].mxu1 %vm467_vm3, %v826_v17 }
 0x1ee   : > { %1316 = vmatprep.mubr.msk.bf16.mxu1 %vm1447_vm2, %v1446_v6  ;;  %1315 = vmatpush3.bf16.msra.mxu1 %v1379_v19 }
 0x1ef   : > { %1299 = vmatmul.mubr.msk.bf16.vlgmr.msra.gmra.mrb[16].mxu0 %vm467_vm3, %v776_v18  ;;  %1326 = vmatprep.subr.bf16.mxu1 %v1446_v6 }
 0x1f0   : > { %1310 = vmatprep.mubr.msk.bf16.mxu0 %vm1447_vm2, %v1446_v6  ;;  %1309 = vmatpush3.bf16.msra.mxu0 %v1378_v20 }
 0x1f1   : > { %1320 = vmatprep.subr.bf16.mxu0 %v1446_v6 }
 0x2b8   : > { %v768_v21 = vpop.f32.mrb[12].mxu1 }
 0x2b9   : > { %v1294_v22 = vpop.f32.mrb[13].mxu1 }
 0x2ba   : > { %v722_v23 = vpop.f32.mrb[12].mxu0  ;;  %v771_v24 = vpop.f32.mrb[14].mxu1 }
 0x2bb   : > { %v769_v25 = vadd.f32 %v768_v21, %v722_v23  ;;  %v1288_v26 = vpop.f32.mrb[13].mxu0  ;;  %v1295_v27 = vpop.f32.mrb[15].mxu1 }
 0x2bc   : > { %v725_v28 = vpop.f32.mrb[14].mxu0 }
 0x2bd   : > { %v1289_v29 = vpop.f32.mrb[15].mxu0 }
 0x2c0   : > { %v867_v30 = vpop.f32.mrb[16].mxu1 }
 0x2c1   : > { %v1306_v31 = vpop.f32.mrb[17].mxu1 }
 0x2c2   : > { %v817_v32 = vpop.f32.mrb[16].mxu0  ;;  %v870_v33 = vpop.f32.mrb[18].mxu1 }
 0x2c3   : > { %v823_v34 = vadd.f32 %v817_v32, %v769_v25  ;;  %v1300_v35 = vpop.f32.mrb[17].mxu0  ;;  %v1307_v36 = vpop.f32.mrb[19].mxu1 }
 0x2c4   : > { %v820_v38 = vpop.f32.mrb[18].mxu0 }
 0x2c5   : > { %v873_v39 = vadd.f32 %v867_v30, %v823_v34  ;;  %v1301_v40 = vpop.f32.mrb[19].mxu0 }
 0x2c7   : > { %v881_v41 = vadd.f32 %v1202_v37, %v873_v39 }
 0x2c9   : > { %v882_v42 = vmax.f32 %v881_v41, 0.0 }
 0x2cb   : > { %v883_v44 = vpack.c.bf16 %v882_v42, %v882_v42 }
 0x2cd   : > { %v890_v46 = vshrl.u32 %v883_v44, 16  ;;  %1317 = vmatmul.mubr.msk.bf16.vlgmr.msra.gmra.mrb[20].mxu1 %vm374_vm0, %v883_v44  ;;  %v993_v48 = vrot.slane %v883_v44, 1 }
 0x2ce   : > { %1327 = vmatpush3.bf16.msra.mxu1 %v1381_v43  ;;  %1328 = vmatprep.mubr.msk.bf16.mxu1 %vm1447_vm2, %v1446_v6 }
 0x2cf   : > { %1311 = vmatmul.mubr.msk.bf16.vlgmr.msra.gmra.mrb[20].mxu0 %vm374_vm0, %v890_v46  ;;  %v1047_v47 = vrot.slane %v890_v46, 1 }
 0x2d0   : > { %1321 = vmatpush3.bf16.msra.mxu0 %v1380_v45  ;;  %1322 = vmatprep.mubr.msk.bf16.mxu0 %vm1447_vm2, %v1446_v6 }
 0x2d5   : > { %1329 = vmatmul.mubr.msk.bf16.vlgmr.msra.gmra.mrb[24].mxu1 %vm374_vm0, %v1047_v47 }
 0x2d7   : > { %1323 = vmatmul.mubr.msk.bf16.vlgmr.msra.gmra.mrb[24].mxu0 %vm374_vm0, %v993_v48 }
 0x3a0   : > { %v983_v49 = vpop.f32.mrb[20].mxu1 }
 0x3a1   : > { %v1318_v50 = vpop.f32.mrb[21].mxu1 }
 0x3a2   : > { %v935_v51 = vpop.f32.mrb[20].mxu0  ;;  %v986_v52 = vpop.f32.mrb[22].mxu1 }
 0x3a3   : > { %v984_v53 = vadd.f32 %v983_v49, %v935_v51  ;;  %v1312_v54 = vpop.f32.mrb[21].mxu0  ;;  %v1319_v55 = vpop.f32.mrb[23].mxu1 }
 0x3a4   : > { %v938_v56 = vpop.f32.mrb[22].mxu0 }
 0x3a5   : > { %v1313_v57 = vpop.f32.mrb[23].mxu0 }
 0x3a8   : > { %v1091_v58 = vpop.f32.mrb[24].mxu1 }
 0x3a9   : > { %v1330_v59 = vpop.f32.mrb[25].mxu1 }
 0x3aa   : > { %v1037_v6 = vpop.f32.mrb[24].mxu0  ;;  %v1094_v60 = vpop.f32.mrb[26].mxu1 }
 0x3ab   : > { %v1043_v61 = vadd.f32 %v1037_v6, %v984_v53  ;;  %v1324_v62 = vpop.f32.mrb[25].mxu0  ;;  %v1331_v63 = vpop.f32.mrb[27].mxu1 }
 0x3ac   : > { %v1040_v1 = vpop.f32.mrb[26].mxu0 }
 0x3ad   : > { %v1097_v2 = vadd.f32 %v1091_v58, %v1043_v61  ;;  %v1325_v3 = vpop.f32.mrb[27].mxu0 }
 0x3af   : > { %v1099_v4 = vadd.f32 %v1098_v0, %v1097_v2 }
 0x3b1   : > { %v1100_v5 = vmax.f32 %v1099_v4, 0.0 }
 0x3b3   : > { %1102 = vst.msk [vmem:[%s324_s26] sm:$0x1] %vm1101_vm4, %v1100_v5 }
 0x3b4   : > { %1395 = shalt.err (!%p1392_p3)
}
 0x3b5   : > { %s1396_s22 = scalar_lea.hbm %s1668_s14, 16  ;;  %s1400_s26 = scalar_lea.hbm %s1719_s9, 32 }
 0x3b6   : > { %p1397_p4 = scmp.ne.s32.totalorder %s1668_s14, %s1396_s22  ;;  %p1401_p9 = scmp.lt.u32.totalorder %s1668_s14, %s1719_s9 }
 0x3b7   : > { %p1402_p10 = scmp.lt.u32.totalorder %s1400_s26, %s1396_s22  ;;  %p1404_p12 = scmp.lt.u32.totalorder %s1396_s22, %s1668_s14 }
 0x3b8   : > { %p1398_p7 = pnand %p1397_p4, %p1537_p5 }
 0x3b9   : > { %p1403_p11 = por %p1402_p10, %p1401_p9 }
 0x3ba   : > { %p1399_p8 = pneg %p1398_p7 }
 0x3bb   : > { %p1405_p13 = por %p1404_p12, %p1403_p11 }
 0x3bd   : > { %p1406_p0 = pnand %p1405_p13, %p1399_p8 }
 0x3bf   : > { %1409 = shalt.err (!%p1406_p0)
}
 0x3c0   : > { %1332 = dma.vmem_to_hbm [thread:$0]  (%p1537_p5), %s1670_s27, 16, %s1668_s14, %s1104_s16  }
 0x3c1 PF: > { %p1338_p1 = scmp.ge.s32.totalorder %s1444_s12, 2  ;;  %s1128_s17 = sand.u32 1, %s1432_s30  }
 0x3c2   : > { %s1129_s13 = scalar_lea.sflag [#allocation3], %s1128_s17 }
 0x3c3   : > { %p1335_p2 = pnand %p1338_p1, %p1541_p6 }
 0x3c5   : > { %1427 = dma.done.wait (!%p1335_p2), %s1129_s13, 16  }
 0x3c6   : > { %1429 = vsyncadd (!%p1335_p2), %s1129_s13, 4294967280  ;;  %p19_p3 = scmp.ge.s32.totalorder %s1524_s15, 4   ;;  %s1722_s30 = smov %s1436_s10 }
 0x3c7   : > { %s1723_s10 = smov %s1440_s11  ;;  %s1724_s11 = smov %s1535_s18 }
 0x3c8   : > { %s1725_s12 = smov %s1524_s15  ;;  %21 = sbr.rel (!%p19_p3) target bundleno = 3 (0x3), region = 100 }
 0x3cf   :  { %1133 = vsyncpa [#allocation3], 1 }
 0x3d0   :  { %1135 = vsyncpa [#allocation3 + $0x1], 1 }

</bundles_post_ra>
